<compile_context>
chip_gen: v7x
topology: tpu7x:2x2x1
jax: 0.10.0
libtpu: 0.0.40
codegen_flags: <defaults>
</compile_context>

<pallas_src>
import functools

import jax
import jax.numpy as jnp
from jax.experimental import pallas as pl
from jax.experimental.pallas import tpu as pltpu


def _round_up(x, m):
    return ((x + m - 1) // m) * m


def _reformulator_kernel(q_ref, d_ref, w1q_ref, w1d_ref, b1_ref,
                         w2_ref, b2_ref, w3_ref, b3_ref, o_ref):
    bf = jnp.bfloat16
    q = q_ref[...].astype(bf)
    d = d_ref[...].astype(bf)
    # input layer (split W1) + bias + ReLU; dropout = identity in eval mode
    h = (jnp.dot(q, w1q_ref[...], preferred_element_type=jnp.float32)
         + jnp.dot(d, w1d_ref[...], preferred_element_type=jnp.float32)
         + b1_ref[...])
    h = jnp.maximum(h, 0.0)
    # hidden layer h1 + ReLU
    h = jnp.dot(h.astype(bf), w2_ref[...], preferred_element_type=jnp.float32) + b2_ref[...]
    h = jnp.maximum(h, 0.0)
    # output layer (output dim zero-padded to 128 lanes; padded lanes are exactly 0)
    y = jnp.dot(h.astype(bf), w3_ref[...], preferred_element_type=jnp.float32) + b3_ref[...]
    # F.normalize(p=2, dim=1): y / max(||y||, 1e-12) == y * rsqrt(max(||y||^2, 1e-24))
    ss = jnp.sum(y * y, axis=-1, keepdims=True)          # padded lanes contribute 0
    inv = jax.lax.rsqrt(jnp.maximum(ss, 1e-24))
    yn = y * inv
    o_ref[...] = yn[:, : o_ref.shape[-1]]


def prepare_params(params, top_k, embedding_size, lane=128):
    """One-time transform of PyTorch-style params into kernel-ready form.

    * Splits/permutes w1 rows so the kernel can consume q and doc-flat directly
      (exactly the interleaved cat/flatten of the PyTorch forward).
    * Zero-pads h1/h2/output dims to 128-lane multiples (numerically exact).
    * Casts weights to bf16 (f32 accumulation in-kernel); biases stay f32.
    """
    w1, b1, w2, b2, w3, b3 = params
    E, K = embedding_size, top_k
    in_dim, h1 = w1.shape
    h2 = w2.shape[1]
    assert in_dim == (K + 1) * E
    # Interleaved input layout: flat index e*(K+1)     -> q[e]
    #                           flat index e*(K+1)+1+k -> d_k[e]
    w1r = w1.reshape(E, K + 1, h1)
    w1q = w1r[:, 0, :]                                                  # [E, h1]
    w1d = jnp.transpose(w1r[:, 1:, :], (1, 0, 2)).reshape(K * E, h1)    # row k*E + e

    h1p = _round_up(h1, lane)
    h2p = _round_up(h2, lane)
    ep = _round_up(E, lane)

    def pad(a, shape):
        out = jnp.zeros(shape, a.dtype)
        return out.at[tuple(slice(0, s) for s in a.shape)].set(a)

    bf = jnp.bfloat16
    return (pad(w1q, (E, h1p)).astype(bf),
            pad(w1d, (K * E, h1p)).astype(bf),
            pad(b1, (1, h1p)),
            pad(w2, (h1p, h2p)).astype(bf),
            pad(b2, (1, h2p)),
            pad(w3, (h2p, ep)).astype(bf),
            pad(b3, (1, ep)))


def neural_reformulator_forward(query_embedding, document_embeddings,
                                prepared_params, top_k, block_b=None):
    """Batched forward. query_embedding: [B, E], document_embeddings: [B, N, E]."""
    w1q, w1d, b1, w2, b2, w3, b3 = prepared_params
    B, E = query_embedding.shape
    K = top_k
    # Contiguous slice + reshape (no transpose/concat): row layout k*E + e matches w1d.
    d_flat = document_embeddings[:, :K].reshape(B, K * E)

    h1p = w1q.shape[1]
    h2p = w2.shape[1]
    ep = w3.shape[1]

    # Batch tile: multiple of 8 sublanes. At these layer sizes even block_b=256 uses
    # well under the 32 MiB default scoped VMEM limit (budgeted against v7x's 64 MiB
    # physical), so no explicit vmem_limit_bytes is needed.
    if block_b is None:
        block_b = B if B <= 8 else max(8, min(256, (B // 8) * 8))
    tb = min(block_b, B)
    nb = pl.cdiv(B, tb)

    flops = 2 * B * ((E + K * E) * h1p + h1p * h2p + h2p * ep)
    bytes_accessed = (4 * B * E + 4 * B * K * E + 4 * B * E
                      + 2 * (E * h1p + K * E * h1p + h1p * h2p + h2p * ep)
                      + 4 * (h1p + h2p + ep))
    cost = pl.CostEstimate(flops=flops, transcendentals=B,
                           bytes_accessed=bytes_accessed)

    out = pl.pallas_call(
        _reformulator_kernel,
        out_shape=jax.ShapeDtypeStruct((B, E), jnp.float32),
        grid_spec=pltpu.PrefetchScalarGridSpec(
            num_scalar_prefetch=0,
            grid=(nb,),
            in_specs=[
                pl.BlockSpec((tb, E), lambda i: (i, 0)),        # q (batch-tiled)
                pl.BlockSpec((tb, K * E), lambda i: (i, 0)),    # doc-flat (batch-tiled)
                pl.BlockSpec((E, h1p), lambda i: (0, 0)),       # weights stay VMEM-resident
                pl.BlockSpec((K * E, h1p), lambda i: (0, 0)),
                pl.BlockSpec((1, h1p), lambda i: (0, 0)),
                pl.BlockSpec((h1p, h2p), lambda i: (0, 0)),
                pl.BlockSpec((1, h2p), lambda i: (0, 0)),
                pl.BlockSpec((h2p, ep), lambda i: (0, 0)),
                pl.BlockSpec((1, ep), lambda i: (0, 0)),
            ],
            out_specs=pl.BlockSpec((tb, E), lambda i: (i, 0)),
        ),
        compiler_params=pltpu.CompilerParams(
            dimension_semantics=("parallel",)),   # megacore sharding on v7x
        cost_estimate=cost,
    )(query_embedding, d_flat, w1q, w1d, b1, w2, b2, w3, b3)
    return out


def init_params(key, top_k, embedding_size, hidden_size1, hidden_size2):
    """Deterministic PyTorch-Linear-style init: U(-1/sqrt(fan_in), 1/sqrt(fan_in)).
    Weights stored as [in, out] (transposed vs torch)."""
    assert hidden_size2 != 0  # TODO(synk): hidden_size2 == 0 branch (skip h1) not wired here.
    in_dim = (top_k + 1) * embedding_size
    ks = jax.random.split(key, 6)

    def lin(kw, kb, fan_in, fan_out):
        bound = 1.0 / jnp.sqrt(float(fan_in))
        w = jax.random.uniform(kw, (fan_in, fan_out), jnp.float32, -bound, bound)
        b = jax.random.uniform(kb, (1, fan_out), jnp.float32, -bound, bound)
        return w, b

    w1, b1 = lin(ks[0], ks[1], in_dim, hidden_size1)
    w2, b2 = lin(ks[2], ks[3], hidden_size1, hidden_size2)
    w3, b3 = lin(ks[4], ks[5], hidden_size2, embedding_size)
    return (w1, b1, w2, b2, w3, b3)


def _reference_forward_f32(query_embedding, document_embeddings, params, top_k):
    """Pure-JAX, full-f32 reference mirroring the PyTorch forward (eval mode)."""
    w1, b1, w2, b2, w3, b3 = params
    B, E = query_embedding.shape
    q_emb = query_embedding[:, :, None]
    d_emb = jnp.transpose(document_embeddings[:, :top_k], (0, 2, 1))
    x = jnp.concatenate([q_emb, d_emb], axis=2).reshape(B, -1)
    x = jnp.maximum(x @ w1 + b1, 0.0)
    x = jnp.maximum(x @ w2 + b2, 0.0)
    x = x @ w3 + b3
    n = jnp.sqrt(jnp.sum(x * x, axis=1, keepdims=True))
    return x / jnp.maximum(n, 1e-12)


def _reference_forward_mirror(query_embedding, document_embeddings, prep, top_k, E):
    """Pure-JAX reference that mirrors the kernel's numerics (bf16 matmuls, f32 acc)."""
    w1q, w1d, b1, w2, b2, w3, b3 = prep
    bf = jnp.bfloat16
    B = query_embedding.shape[0]
    d_flat = document_embeddings[:, :top_k].reshape(B, top_k * E)
    h = (jnp.dot(query_embedding.astype(bf), w1q, preferred_element_type=jnp.float32)
         + jnp.dot(d_flat.astype(bf), w1d, preferred_element_type=jnp.float32) + b1)
    h = jnp.maximum(h, 0.0)
    h = jnp.dot(h.astype(bf), w2, preferred_element_type=jnp.float32) + b2
    h = jnp.maximum(h, 0.0)
    y = jnp.dot(h.astype(bf), w3, preferred_element_type=jnp.float32) + b3
    inv = jax.lax.rsqrt(jnp.maximum(jnp.sum(y * y, axis=-1, keepdims=True), 1e-24))
    return (y * inv)[:, :E]


if __name__ == "__main__":
    top_k = 4
    embedding_size = 32
    hidden_size1 = 64
    hidden_size2 = 32
    B, N_docs = 16, 6          # small batch; block_b=8 exercises a 2-step parallel grid

    key = jax.random.PRNGKey(0)
    k_q, k_d, k_p = jax.random.split(key, 3)
    query_embedding = jax.random.normal(k_q, (B, embedding_size), jnp.float32)
    document_embeddings = jax.random.normal(k_d, (B, N_docs, embedding_size), jnp.float32)
    params = init_params(k_p, top_k, embedding_size, hidden_size1, hidden_size2)
    prep = prepare_params(params, top_k, embedding_size)

    fwd = jax.jit(functools.partial(neural_reformulator_forward, top_k=top_k, block_b=8))
    out = fwd(query_embedding, document_embeddings, prep)
    out = jax.block_until_ready(out)
    assert out.shape == (B, embedding_size)

    # Tight check against a reference that mirrors the kernel's mixed precision.
    mirror = _reference_forward_mirror(query_embedding, document_embeddings, prep,
                                       top_k, embedding_size)
    assert jnp.allclose(out, mirror, atol=1e-4, rtol=1e-4), "mismatch vs bf16-mirroring reference"

    # Loose angular check against the full-f32 PyTorch-faithful reference
    # (outputs are unit vectors; bf16 matmuls give ~1% relative error).
    ref32 = _reference_forward_f32(query_embedding, document_embeddings, params, top_k)
    max_l2 = float(jnp.max(jnp.linalg.norm(out - ref32, axis=1)))
    assert max_l2 < 0.05, f"too far from f32 reference: {max_l2}"

    print("KERNEL_OK")
</pallas_src>

<mosaic_0001>
module attributes {stable_mosaic.version = 11 : i64} {
  func.func @_reformulator_kernel(%arg0: i32, %arg1: memref<8x32xf32, #tpu.memory_space<vmem>>, %arg2: memref<8x128xf32, #tpu.memory_space<vmem>>, %arg3: memref<32x128xbf16, #tpu.memory_space<vmem>>, %arg4: memref<128x128xbf16, #tpu.memory_space<vmem>>, %arg5: memref<1x128xf32, #tpu.memory_space<vmem>>, %arg6: memref<128x128xbf16, #tpu.memory_space<vmem>>, %arg7: memref<1x128xf32, #tpu.memory_space<vmem>>, %arg8: memref<128x128xbf16, #tpu.memory_space<vmem>>, %arg9: memref<1x128xf32, #tpu.memory_space<vmem>>, %arg10: memref<8x32xf32, #tpu.memory_space<vmem>>) attributes {dimension_semantics = [#tpu.dimension_semantics<parallel>], iteration_bounds = array<i64: 2>, scalar_prefetch = 0 : i64, scratch_operands = 0 : i64, tpu.core_type = #tpu.core_type<tc>, window_params = [{transform_indices = @transform_0, window_bounds = array<i64: 8, 32>}, {transform_indices = @transform_1, window_bounds = array<i64: 8, 128>}, {pipeline_mode = #tpu.pipeline_mode<synchronous>, transform_indices = @transform_2, window_bounds = array<i64: 32, 128>}, {pipeline_mode = #tpu.pipeline_mode<synchronous>, transform_indices = @transform_3, window_bounds = array<i64: 128, 128>}, {pipeline_mode = #tpu.pipeline_mode<synchronous>, transform_indices = @transform_4, window_bounds = array<i64: 1, 128>}, {pipeline_mode = #tpu.pipeline_mode<synchronous>, transform_indices = @transform_5, window_bounds = array<i64: 128, 128>}, {pipeline_mode = #tpu.pipeline_mode<synchronous>, transform_indices = @transform_6, window_bounds = array<i64: 1, 128>}, {pipeline_mode = #tpu.pipeline_mode<synchronous>, transform_indices = @transform_7, window_bounds = array<i64: 128, 128>}, {pipeline_mode = #tpu.pipeline_mode<synchronous>, transform_indices = @transform_8, window_bounds = array<i64: 1, 128>}, {transform_indices = @transform_9, window_bounds = array<i64: 8, 32>}]} {
    %c0 = arith.constant 0 : index
    %c0_0 = arith.constant 0 : index
    %0 = vector.load %arg1[%c0, %c0_0] : memref<8x32xf32, #tpu.memory_space<vmem>>, vector<8x32xf32>
    %1 = arith.truncf %0 : vector<8x32xf32> to vector<8x32xbf16>
    %c0_1 = arith.constant 0 : index
    %c0_2 = arith.constant 0 : index
    %2 = vector.load %arg2[%c0_1, %c0_2] : memref<8x128xf32, #tpu.memory_space<vmem>>, vector<8x128xf32>
    %3 = arith.truncf %2 : vector<8x128xf32> to vector<8x128xbf16>
    %c0_3 = arith.constant 0 : index
    %c0_4 = arith.constant 0 : index
    %4 = vector.load %arg3[%c0_3, %c0_4] : memref<32x128xbf16, #tpu.memory_space<vmem>>, vector<32x128xbf16>
    %cst = arith.constant dense<0.000000e+00> : vector<8x128xf32>
    %5 = tpu.matmul %1, %4, %cst {dimension_numbers = #tpu.dot_dimension_numbers<[1], [0], [0], [1], [0, 0, 1, 1], [], []>} : vector<8x32xbf16>, vector<32x128xbf16>, vector<8x128xf32> -> vector<8x128xf32>
    %c0_5 = arith.constant 0 : index
    %c0_6 = arith.constant 0 : index
    %6 = vector.load %arg4[%c0_5, %c0_6] : memref<128x128xbf16, #tpu.memory_space<vmem>>, vector<128x128xbf16>
    %cst_7 = arith.constant dense<0.000000e+00> : vector<8x128xf32>
    %7 = tpu.matmul %3, %6, %cst_7 {dimension_numbers = #tpu.dot_dimension_numbers<[1], [0], [0], [1], [0, 0, 1, 1], [], []>} : vector<8x128xbf16>, vector<128x128xbf16>, vector<8x128xf32> -> vector<8x128xf32>
    %8 = arith.addf %5, %7 : vector<8x128xf32>
    %c0_8 = arith.constant 0 : index
    %c0_9 = arith.constant 0 : index
    %9 = vector.load %arg5[%c0_8, %c0_9] : memref<1x128xf32, #tpu.memory_space<vmem>>, vector<1x128xf32>
    %10 = vector.broadcast %9 : vector<1x128xf32> to vector<8x128xf32>
    %11 = arith.addf %8, %10 : vector<8x128xf32>
    %cst_10 = arith.constant 0.000000e+00 : f32
    %12 = vector.broadcast %cst_10 : f32 to vector<8x128xf32>
    %13 = arith.maximumf %11, %12 : vector<8x128xf32>
    %14 = arith.truncf %13 : vector<8x128xf32> to vector<8x128xbf16>
    %c0_11 = arith.constant 0 : index
    %c0_12 = arith.constant 0 : index
    %15 = vector.load %arg6[%c0_11, %c0_12] : memref<128x128xbf16, #tpu.memory_space<vmem>>, vector<128x128xbf16>
    %cst_13 = arith.constant dense<0.000000e+00> : vector<8x128xf32>
    %16 = tpu.matmul %14, %15, %cst_13 {dimension_numbers = #tpu.dot_dimension_numbers<[1], [0], [0], [1], [0, 0, 1, 1], [], []>} : vector<8x128xbf16>, vector<128x128xbf16>, vector<8x128xf32> -> vector<8x128xf32>
    %c0_14 = arith.constant 0 : index
    %c0_15 = arith.constant 0 : index
    %17 = vector.load %arg7[%c0_14, %c0_15] : memref<1x128xf32, #tpu.memory_space<vmem>>, vector<1x128xf32>
    %18 = vector.broadcast %17 : vector<1x128xf32> to vector<8x128xf32>
    %19 = arith.addf %16, %18 : vector<8x128xf32>
    %cst_16 = arith.constant 0.000000e+00 : f32
    %20 = vector.broadcast %cst_16 : f32 to vector<8x128xf32>
    %21 = arith.maximumf %19, %20 : vector<8x128xf32>
    %22 = arith.truncf %21 : vector<8x128xf32> to vector<8x128xbf16>
    %c0_17 = arith.constant 0 : index
    %c0_18 = arith.constant 0 : index
    %23 = vector.load %arg8[%c0_17, %c0_18] : memref<128x128xbf16, #tpu.memory_space<vmem>>, vector<128x128xbf16>
    %cst_19 = arith.constant dense<0.000000e+00> : vector<8x128xf32>
    %24 = tpu.matmul %22, %23, %cst_19 {dimension_numbers = #tpu.dot_dimension_numbers<[1], [0], [0], [1], [0, 0, 1, 1], [], []>} : vector<8x128xbf16>, vector<128x128xbf16>, vector<8x128xf32> -> vector<8x128xf32>
    %c0_20 = arith.constant 0 : index
    %c0_21 = arith.constant 0 : index
    %25 = vector.load %arg9[%c0_20, %c0_21] : memref<1x128xf32, #tpu.memory_space<vmem>>, vector<1x128xf32>
    %26 = vector.broadcast %25 : vector<1x128xf32> to vector<8x128xf32>
    %27 = arith.addf %24, %26 : vector<8x128xf32>
    %28 = arith.mulf %27, %27 : vector<8x128xf32>
    %cst_22 = arith.constant dense<0.000000e+00> : vector<8xf32>
    %29 = vector.multi_reduction <add>, %28, %cst_22 [1] : vector<8x128xf32> to vector<8xf32>
    %30 = vector.shape_cast %29 : vector<8xf32> to vector<8x1xf32>
    %cst_23 = arith.constant 1.000000e-24 : f32
    %31 = vector.broadcast %cst_23 : f32 to vector<8x1xf32>
    %32 = arith.maximumf %30, %31 : vector<8x1xf32>
    %33 = math.rsqrt %32 : vector<8x1xf32>
    %34 = vector.broadcast %33 : vector<8x1xf32> to vector<8x128xf32>
    %35 = arith.mulf %27, %34 : vector<8x128xf32>
    %36 = vector.extract_strided_slice %35 {offsets = [0, 0], sizes = [8, 32], strides = [1, 1]} : vector<8x128xf32> to vector<8x32xf32>
    %c0_24 = arith.constant 0 : index
    %c0_25 = arith.constant 0 : index
    %37 = vector.load %arg10[%c0_24, %c0_25] : memref<8x32xf32, #tpu.memory_space<vmem>>, vector<8x32xf32>
    tpu.vector_store %arg10[%c0_24, %c0_25], %36 {strides = array<i32>} : memref<8x32xf32, #tpu.memory_space<vmem>>, vector<8x32xf32>,
    return
  }
  func.func @transform_0(%arg0: i32) -> (i32, i32) {
    %c0_i32 = arith.constant 0 : i32
    %c0_i32_0 = arith.constant 0 : i32
    return %arg0, %c0_i32 : i32, i32
  }
  func.func @transform_1(%arg0: i32) -> (i32, i32) {
    %c0_i32 = arith.constant 0 : i32
    %c0_i32_0 = arith.constant 0 : i32
    return %arg0, %c0_i32 : i32, i32
  }
  func.func @transform_2(%arg0: i32) -> (i32, i32) {
    %c0_i32 = arith.constant 0 : i32
    %c0_i32_0 = arith.constant 0 : i32
    %c0_i32_1 = arith.constant 0 : i32
    return %c0_i32, %c0_i32_0 : i32, i32
  }
  func.func @transform_3(%arg0: i32) -> (i32, i32) {
    %c0_i32 = arith.constant 0 : i32
    %c0_i32_0 = arith.constant 0 : i32
    %c0_i32_1 = arith.constant 0 : i32
    return %c0_i32, %c0_i32_0 : i32, i32
  }
  func.func @transform_4(%arg0: i32) -> (i32, i32) {
    %c0_i32 = arith.constant 0 : i32
    %c0_i32_0 = arith.constant 0 : i32
    %c0_i32_1 = arith.constant 0 : i32
    return %c0_i32, %c0_i32_0 : i32, i32
  }
  func.func @transform_5(%arg0: i32) -> (i32, i32) {
    %c0_i32 = arith.constant 0 : i32
    %c0_i32_0 = arith.constant 0 : i32
    %c0_i32_1 = arith.constant 0 : i32
    return %c0_i32, %c0_i32_0 : i32, i32
  }
  func.func @transform_6(%arg0: i32) -> (i32, i32) {
    %c0_i32 = arith.constant 0 : i32
    %c0_i32_0 = arith.constant 0 : i32
    %c0_i32_1 = arith.constant 0 : i32
    return %c0_i32, %c0_i32_0 : i32, i32
  }
  func.func @transform_7(%arg0: i32) -> (i32, i32) {
    %c0_i32 = arith.constant 0 : i32
    %c0_i32_0 = arith.constant 0 : i32
    %c0_i32_1 = arith.constant 0 : i32
    return %c0_i32, %c0_i32_0 : i32, i32
  }
  func.func @transform_8(%arg0: i32) -> (i32, i32) {
    %c0_i32 = arith.constant 0 : i32
    %c0_i32_0 = arith.constant 0 : i32
    %c0_i32_1 = arith.constant 0 : i32
    return %c0_i32, %c0_i32_0 : i32, i32
  }
  func.func @transform_9(%arg0: i32) -> (i32, i32) {
    %c0_i32 = arith.constant 0 : i32
    %c0_i32_0 = arith.constant 0 : i32
    return %arg0, %c0_i32 : i32, i32
  }
}

</mosaic_0001>

<bundles_post_ra>
// kernel: neural_reformulator_forward.1
= control target key start
LH: loop header
LB: loop body
LE: loop exit
PB: predicated region body
PF: predicated region fallthrough
CT: control target
= control target key end

     0   :  { %14 = vsyncpa [#allocation3], 0  ;;  %s1398_s0 = inlined_call_operand.vmem [shape: f32[16,32], index: 0, kind: input, shape index: {}]   ;;  %s1399_s1 = inlined_call_operand.vmem [shape: f32[16,128], index: 1, kind: input, shape index: {}]   ;;  %s1400_s2 = inlined_call_operand.vmem [shape: bf16[32,128], index: 2, kind: input, shape index: {}]   ;;  %s1401_s3 = inlined_call_operand.vmem [shape: bf16[128,128], index: 3, kind: input, shape index: {}]   ;;  %s1402_s4 = inlined_call_operand.vmem [shape: f32[1,128], index: 4, kind: input, shape index: {}]   ;;  %s1403_s5 = inlined_call_operand.vmem [shape: bf16[128,128], index: 5, kind: input, shape index: {}]   ;;  %s1404_s6 = inlined_call_operand.vmem [shape: f32[1,128], index: 6, kind: input, shape index: {}]   ;;  %s1405_s7 = inlined_call_operand.vmem [shape: bf16[128,128], index: 7, kind: input, shape index: {}]   ;;  %s1406_s8 = inlined_call_operand.vmem [shape: f32[1,128], index: 8, kind: input, shape index: {}]   ;;  %s1407_s9 = inlined_call_operand.hbm [shape: f32[16,32], index: 9, kind: output, shape index: {}]  }
   0x1   :  { %16 = vsyncpa [#allocation3 + $0x1], 0  ;;  %s1165_s30 = smov 0   ;;  %s1167_s10 = smov 0  }
   0x2   :  { %s1169_s11 = smov 0   ;;  %s1171_s12 = smov 0  }
   0x3 LB: > { %s1186_s13 = sadd.s32 4294967295, %s1110_s12   ;;  %s840_s14 = sadd.s32 4294967294, %s1110_s12   ;;  %s1110_s12 = sphi %s1171_s12, %s1413_s12   ;;  %s1106_s11 = sphi %s1169_s11, %s1412_s11   ;;  %s1102_s10 = sphi %s1167_s10, %s1411_s10   ;;  %s1098_s30 = sphi %s1165_s30, %s1410_s30  }
   0x4   : > { %s1190_s15 = sadd.s32 1, %s1110_s12   ;;  %s228_s16 = sadd.s32 1, %s1106_s11 }
   0x5   : > { %s225_s17 = ssub.s32 %s1110_s12, %s1190_s15  ;;  %p238_p0 = scmp.ne.s32.totalorder %s1106_s11, %s1102_s10 }
   0x6   : > { %p226_p1 = scmp.eq.s32.totalorder %s225_s17, 0  ;;  %p239_p2 = scmp.eq.s32.totalorder %s1186_s13, 1 }
   0x7   : > { %p244_p3 = scmp.ne.s32.totalorder %s1102_s10, %s1098_s30  ;;  %p245_p4 = scmp.eq.s32.totalorder %s840_s14, 1 }
   0x8   : > { %s1201_s18 = scalar_select %p226_p1, %s1106_s11, %s228_s16  }
   0x9   : > { %p1203_p5 = por %p239_p2, %p238_p0  ;;  %p1207_p6 = por %p245_p4, %p244_p3 }
   0xa   : > { %p843_p7 = scmp.ge.s32.totalorder %s1110_s12, 1  ;;  %p298_p8 = scmp.lt.s32.totalorder %s1110_s12, 3 }
   0xc   : > { %p299_p9 = pnand %p843_p7, %p298_p8 }
   0xd   : > { %v1020_v0 = vld [vmem:[%s1401_s3] sm:$0xff] (!%p299_p9)   ;;  %v1112_v1 = vmov (!%p299_p9), 0.0   ;;  %v1021_v2 = vld [vmem:[%s1401_s3 + $0x8] sm:$0xff] (!%p299_p9)   ;;  %vm1113_vm0 = vmmov (!%p299_p9), 0   ;;  %p337_p10 = scmp.lt.s32.totalorder (!%p299_p9), %s1186_s13, 1  ;;  %v1022_v3 = vld [vmem:[%s1401_s3 + $0x10] sm:$0xff] (!%p299_p9)  }
   0xe   : > { %302 = sbr.rel (%p299_p9) target bundleno = 871 (0x367), region = 56  ;;  %911 = vmatprep.subr.bf16.mxu0 (!%p299_p9), %v1112_v1  ;;  %931 = vmatprep.subr.bf16.mxu1 (!%p299_p9), %v1112_v1  ;;  %v1026_v4 = vld [vmem:[%s1400_s2] sm:$0xff] (!%p299_p9)   ;;  %v1028_v5 = vld [vmem:[%s1400_s2 + $0x8] sm:$0xff] (!%p299_p9)   ;;  %v1023_v6 = vld [vmem:[%s1401_s3 + $0x18] sm:$0xff] (!%p299_p9)   ;;  %vm470_vm1 = vcmask (!%p299_p9), 261120   ;;  %s334_s16 = sand.u32 (!%p299_p9), 1, %s1102_s10  }
   0xf   : > { %912 = vmatpush3.bf16.msra.mxu0 (!%p299_p9), %v1020_v0  ;;  %935 = vmatprep.mubr.msk.bf16.mxu1 (!%p299_p9), %vm1113_vm0, %v1112_v1  ;;  %v1030_v9 = vld [vmem:[%s1403_s5] sm:$0xff] (!%p299_p9)   ;;  %v1031_v11 = vld [vmem:[%s1403_s5 + $0x8] sm:$0xff] (!%p299_p9)   ;;  %v1032_v13 = vld [vmem:[%s1403_s5 + $0x10] sm:$0xff] (!%p299_p9)  }
  0x10   : > { %913 = vmatprep.subr.bf16.mxu0 (!%p299_p9), %v1112_v1  ;;  %927 = vmatprep.mubr.msk.bf16.mxu0 (!%p299_p9), %vm1113_vm0, %v1112_v1  ;;  %v1024_v10 = vld [vmem:[%s1401_s3 + $0x20] sm:$0xff] (!%p299_p9)   ;;  %v1025_v12 = vld [vmem:[%s1401_s3 + $0x28] sm:$0xff] (!%p299_p9)   ;;  %v1027_v14 = vld [vmem:[%s1401_s3 + $0x30] sm:$0xff] (!%p299_p9)  }
  0x11   : > { %932 = vmatpush3.bf16.msra.mxu1 (!%p299_p9), %v1026_v4  ;;  %v1033_v15 = vld [vmem:[%s1403_s5 + $0x18] sm:$0xff] (!%p299_p9)   ;;  %v1034_v18 = vld [vmem:[%s1403_s5 + $0x20] sm:$0xff] (!%p299_p9)   ;;  %v1035_v20 = vld [vmem:[%s1403_s5 + $0x28] sm:$0xff] (!%p299_p9)  }
  0x12   : > { %933 = vmatprep.subr.bf16.mxu1 (!%p299_p9), %v1112_v1  ;;  %v1029_v16 = vld [vmem:[%s1401_s3 + $0x38] sm:$0xff] (!%p299_p9)   ;;  %v1036_v21 = vld [vmem:[%s1403_s5 + $0x30] sm:$0xff] (!%p299_p9)   ;;  %v1038_v23 = vld [vmem:[%s1405_s7] sm:$0xff] (!%p299_p9)  }
  0x13   : > { %914 = vmatpush3.bf16.msra.mxu0 (!%p299_p9), %v1021_v2  ;;  %v1037_v22 = vld [vmem:[%s1403_s5 + $0x38] sm:$0xff] (!%p299_p9)   ;;  %v1039_v24 = vld [vmem:[%s1405_s7 + $0x8] sm:$0xff] (!%p299_p9)   ;;  %v1040_v25 = vld [vmem:[%s1405_s7 + $0x10] sm:$0xff] (!%p299_p9)  }
  0x14   : > { %915 = vmatprep.subr.bf16.mxu0 (!%p299_p9), %v1112_v1  ;;  %v1041_v26 = vld [vmem:[%s1405_s7 + $0x18] sm:$0xff] (!%p299_p9)   ;;  %v1042_v27 = vld [vmem:[%s1405_s7 + $0x20] sm:$0xff] (!%p299_p9)   ;;  %v1043_v28 = vld [vmem:[%s1405_s7 + $0x28] sm:$0xff] (!%p299_p9)  }
  0x15   : > { %s1228_s25 = scalar_select %p337_p10, %s1186_s13, 1  ;;  %934 = vmatpush3.bf16.msra.mxu1 %v1028_v5  ;;  %v858_v34 = vld [vmem:[%s1402_s4] ss:$0 sm:$0xff]  ;;  %v1044_v42 = vld [vmem:[%s1405_s7 + $0x30] sm:$0xff]   ;;  %v1045_v43 = vld [vmem:[%s1405_s7 + $0x38] sm:$0xff]  }
  0x16   : > { %939 = vmatprep.subr.bf16.mxu1 %v1112_v1  ;;  %v859_v44 = vld [vmem:[%s1404_s6] ss:$0 sm:$0xff] }
  0x17   : > { %s845_s14 = sshll.u32 %s1228_s25, 3  ;;  %916 = vmatpush3.bf16.msra.mxu0 %v1022_v3  ;;  %v868_v52 = vld [vmem:[%s1406_s8] ss:$0 sm:$0xff] }
  0x18   : > { %s340_s21 = scalar_lea.vmem %s1398_s0, %s845_s14  ;;  %917 = vmatprep.subr.bf16.mxu0 %v1112_v1  ;;  %s344_s17 = scalar_lea.vmem %s1399_s1, %s845_s14 }
  0x19   : > { %v346_v7 = vld [vmem:[%s340_s21] sm:$0xff]  ;;  %s878_s21 = sshll.u32 %s1186_s13, 7  ;;  %s756_s14 = scalar_lea.sflag [#allocation3], %s334_s16 }
  0x1a   : > { %v347_v8 = vpack.c.bf16 %v346_v7, %v346_v7  ;;  %v348_v17 = vld [vmem:[%s344_s17] sm:$0xff]  ;;  %s844_s17 = sshll.u32 %s334_s16, 3  ;;  %s1355_s26 = scalar_lea.hbm %s1407_s9, %s878_s21 }
  0x1b   : > { %918 = vmatpush3.bf16.msra.mxu0 %v1023_v6  ;;  %v349_v19 = vpack.c.bf16 %v348_v17, %v348_v17  ;;  %s336_s22 = scalar_lea.vmem [#allocation2], %s844_s17  ;;  %s1114_s13 = smov [#allocation2]  }
  0x1c   : > { %919 = vmatprep.subr.bf16.mxu0 %v1112_v1  ;;  %936 = vmatmul.mubr.msk.bf16.vlgmr.msra.gmra.mrb[0].mxu1 %vm470_vm1, %v347_v8  ;;  %s769_s23 = sshll.u32 %s336_s22, 4  ;;  %s1052_s28 = sshll.u32 %s1114_s13, 4  ;;  %s1357_s23 = int_to_ptr.vmem [resolvable:$true] %s769_s23  ;;  %s1053_s28 = int_to_ptr.vmem [resolvable:$false] %s1052_s28 }
  0x1d   : > { %940 = vmatpush3.bf16.msra.mxu1 %v1030_v9  ;;  %955 = vmatprep.mubr.msk.bf16.mxu1 %vm1113_vm0, %v1112_v1  ;;  %s1048_s27 = scalar_lea.vmem %s1357_s23, 128  ;;  %s1054_s29 = scalar_lea.vmem %s1053_s28, 256 }
  0x1e   : > { %941 = vmatprep.subr.bf16.mxu1 %v1112_v1  ;;  %p1049_p11 = scmp.ne.s32.totalorder %s1357_s23, %s1048_s27  ;;  %p1055_p0 = scmp.lt.s32.totalorder %s1357_s23, %s1053_s28 }
  0x1f   : > { %920 = vmatpush3.bf16.msra.mxu0 %v1024_v10  ;;  %p1056_p1 = scmp.lt.s32.totalorder %s1054_s29, %s1048_s27 }
  0x20   : > { %921 = vmatprep.subr.bf16.mxu0 %v1112_v1  ;;  %p1050_p12 = pnand %p1049_p11, %p1203_p5 }
  0x21   : > { %942 = vmatpush3.bf16.msra.mxu1 %v1031_v11  ;;  %p1057_p2 = por %p1056_p1, %p1055_p0 }
  0x22   : > { %943 = vmatprep.subr.bf16.mxu1 %v1112_v1  ;;  %p1051_p13 = pneg %p1050_p12 }
  0x23   : > { %922 = vmatpush3.bf16.msra.mxu0 %v1025_v12 }
  0x24   : > { %923 = vmatprep.subr.bf16.mxu0 %v1112_v1  ;;  %p1058_p3 = pnand %p1057_p2, %p1051_p13 }
  0x25   : > { %944 = vmatpush3.bf16.msra.mxu1 %v1032_v13 }
  0x26   : > { %945 = vmatprep.subr.bf16.mxu1 %v1112_v1 }
  0x27   : > { %924 = vmatpush3.bf16.msra.mxu0 %v1027_v14 }
  0x28   : > { %925 = vmatprep.subr.bf16.mxu0 %v1112_v1 }
  0x29   : > { %946 = vmatpush3.bf16.msra.mxu1 %v1033_v15 }
  0x2a   : > { %947 = vmatprep.subr.bf16.mxu1 %v1112_v1 }
  0x2b   : > { %926 = vmatpush3.bf16.msra.mxu0 %v1029_v16 }
  0x2c   : > { %959 = vmatprep.subr.bf16.mxu0 %v1112_v1 }
  0x2d   : > { %948 = vmatpush3.bf16.msra.mxu1 %v1034_v18 }
  0x2e   : > { %928 = vmatmul.mubr.bf16.vlgmr.msra.gmra.mrb[0].mxu0 %v349_v19  ;;  %949 = vmatprep.subr.bf16.mxu1 %v1112_v1 }
  0x2f   : > { %975 = vmatprep.mubr.msk.bf16.mxu0 %vm1113_vm0, %v1112_v1  ;;  %960 = vmatpush3.bf16.msra.mxu0 %v1038_v23 }
  0x30   : > { %961 = vmatprep.subr.bf16.mxu0 %v1112_v1 }
  0x31   : > { %950 = vmatpush3.bf16.msra.mxu1 %v1035_v20 }
  0x32   : > { %951 = vmatprep.subr.bf16.mxu1 %v1112_v1 }
  0x33   : > { %962 = vmatpush3.bf16.msra.mxu0 %v1039_v24 }
  0x34   : > { %963 = vmatprep.subr.bf16.mxu0 %v1112_v1 }
  0x35   : > { %952 = vmatpush3.bf16.msra.mxu1 %v1036_v21 }
  0x36   : > { %953 = vmatprep.subr.bf16.mxu1 %v1112_v1 }
  0x37   : > { %964 = vmatpush3.bf16.msra.mxu0 %v1040_v25 }
  0x38   : > { %965 = vmatprep.subr.bf16.mxu0 %v1112_v1 }
  0x39   : > { %954 = vmatpush3.bf16.msra.mxu1 %v1037_v22 }
  0x3b   : > { %966 = vmatpush3.bf16.msra.mxu0 %v1041_v26 }
  0x3c   : > { %967 = vmatprep.subr.bf16.mxu0 %v1112_v1 }
  0x3f   : > { %968 = vmatpush3.bf16.msra.mxu0 %v1042_v27 }
  0x40   : > { %969 = vmatprep.subr.bf16.mxu0 %v1112_v1 }
  0x43   : > { %970 = vmatpush3.bf16.msra.mxu0 %v1043_v28 }
  0x44   : > { %971 = vmatprep.subr.bf16.mxu0 %v1112_v1 }
  0x47   : > { %972 = vmatpush3.bf16.msra.mxu0 %v1044_v42 }
  0x48   : > { %973 = vmatprep.subr.bf16.mxu0 %v1112_v1 }
  0x4b   : > { %974 = vmatpush3.bf16.msra.mxu0 %v1045_v43 }
  0xef   : > { %v508_v29 = vpop.f32.mrb[0].mxu1 }
  0xf0   : > { %v937_v30 = vpop.f32.mrb[1].mxu1 }
  0xf1   : > { %v511_v31 = vpop.f32.mrb[2].mxu1 }
  0xf2   : > { %v938_v32 = vpop.f32.mrb[3].mxu1 }
 0x101   : > { %v452_v33 = vpop.f32.mrb[0].mxu0 }
 0x102   : > { %v509_v35 = vadd.f32 %v508_v29, %v452_v33  ;;  %v929_v36 = vpop.f32.mrb[1].mxu0 }
 0x103   : > { %v455_v37 = vpop.f32.mrb[2].mxu0 }
 0x104   : > { %v521_v38 = vadd.f32 %v858_v34, %v509_v35  ;;  %v930_v39 = vpop.f32.mrb[3].mxu0 }
 0x106   : > { %v522_v40 = vmax.f32 %v521_v38, 0.0 }
 0x108   : > { %v523_v41 = vpack.c.bf16 %v522_v40, %v522_v40 }
 0x10a   : > { %956 = vmatmul.mubr.bf16.vlgmr.msra.gmra.mrb[4].mxu1 %v523_v41 }
 0x1dd   : > { %v629_v45 = vpop.f32.mrb[4].mxu1 }
 0x1de   : > { %v630_v46 = vadd.f32 %v859_v44, %v629_v45  ;;  %v957_v47 = vpop.f32.mrb[5].mxu1 }
 0x1df   : > { %v632_v48 = vpop.f32.mrb[6].mxu1 }
 0x1e0   : > { %v635_v49 = vmax.f32 %v630_v46, 0.0  ;;  %v958_v50 = vpop.f32.mrb[7].mxu1 }
 0x1e2   : > { %v636_v51 = vpack.c.bf16 %v635_v49, %v635_v49 }
 0x1e4   : > { %976 = vmatmul.mubr.bf16.vlgmr.msra.gmra.mrb[4].mxu0 %v636_v51 }
 0x2b7   : > { %v742_v53 = vpop.f32.mrb[4].mxu0 }
 0x2b8   : > { %v743_v54 = vadd.f32 %v868_v52, %v742_v53  ;;  %v977_v55 = vpop.f32.mrb[5].mxu0 }
 0x2b9   : > { %v745_v56 = vpop.f32.mrb[6].mxu0 }
 0x2ba   : > { %v978_v57 = vpop.f32.mrb[7].mxu0  ;;  %v748_v58 = vmul.f32 %v743_v54, %v743_v54 }
 0x2bc   : > { %749 = vadd.xlane.f32.xlu0 %v748_v58 }
 0x349   : > { %v750_v59 = vpop.xlane.xlu0 %749 }
 0x34a   : > { %v751_v60 = vmax.f32 %v750_v59, 1e-24 }
 0x34c   : > { %1046 = vrsqrt.f32 %v751_v60 }
 0x356   : > { %v1047_v61 = vpop.eup %1046 }
 0x357   : > { %v753_v62 = vmul.f32 %v1047_v61, %v743_v54 }
 0x359   : > { %754 = vst.msk [vmem:[%s336_s22] sm:$0xff] %vm470_vm1, %v753_v62 }
 0x35a   : > { %1061 = shalt.err (!%p1058_p3)
}
 0x35b   : > { %s1062_s16 = scalar_lea.hbm %s1355_s26, 128  ;;  %s1066_s22 = scalar_lea.hbm %s1407_s9, 256 }
 0x35c   : > { %p1063_p4 = scmp.ne.s32.totalorder %s1355_s26, %s1062_s16  ;;  %p1067_p9 = scmp.lt.u32.totalorder %s1355_s26, %s1407_s9 }
 0x35d   : > { %p1068_p10 = scmp.lt.u32.totalorder %s1066_s22, %s1062_s16  ;;  %p1070_p12 = scmp.lt.u32.totalorder %s1062_s16, %s1355_s26 }
 0x35e   : > { %p1064_p7 = pnand %p1063_p4, %p1203_p5 }
 0x35f   : > { %p1069_p11 = por %p1068_p10, %p1067_p9 }
 0x360   : > { %p1065_p8 = pneg %p1064_p7 }
 0x361   : > { %p1071_p13 = por %p1070_p12, %p1069_p11 }
 0x363   : > { %p1072_p0 = pnand %p1071_p13, %p1065_p8 }
 0x365   : > { %1075 = shalt.err (!%p1072_p0)
}
 0x366   : > { %979 = dma.vmem_to_hbm [thread:$0]  (%p1203_p5), %s1357_s23, 128, %s1355_s26, %s756_s14  }
 0x367 PF: > { %p985_p1 = scmp.ge.s32.totalorder %s1110_s12, 2  ;;  %s781_s27 = sand.u32 1, %s1098_s30  }
 0x368   : > { %s782_s13 = scalar_lea.sflag [#allocation3], %s781_s27 }
 0x369   : > { %p982_p2 = pnand %p985_p1, %p1207_p6 }
 0x36b   : > { %1093 = dma.done.wait (!%p982_p2), %s782_s13, 128  }
 0x36c   : > { %1095 = vsyncadd (!%p982_p2), %s782_s13, 4294967168  ;;  %p19_p3 = scmp.ge.s32.totalorder %s1190_s15, 4   ;;  %s1410_s30 = smov %s1102_s10 }
 0x36d   : > { %s1411_s10 = smov %s1106_s11  ;;  %s1412_s11 = smov %s1201_s18 }
 0x36e   : > { %s1413_s12 = smov %s1190_s15  ;;  %21 = sbr.rel (!%p19_p3) target bundleno = 3 (0x3), region = 94 }
 0x375   :  { %787 = vsyncpa [#allocation3], 1 }
 0x376   :  { %789 = vsyncpa [#allocation3 + $0x1], 1 }

</bundles_post_ra>
